<compile_context>
chip_gen: v5e
topology: v5e:2x2
jax: 0.10.0
libtpu: 0.0.40
codegen_flags: <defaults>
</compile_context>

<pallas_src>
import math

import jax
import jax.numpy as jnp
from jax.experimental import pallas as pl
from jax.experimental.pallas import tpu as pltpu


_MXU_MIN_CH = 32  # below this, the 1x1 conv runs on the VPU with SMEM scalars


# ----------------------------------------------------------------------------
# Kernels
# ----------------------------------------------------------------------------
def _fused_kernel_small_c(x_ref, w_ref, b_ref, o_ref):
    """Temporal max-pool (k=3,s=2,p=1) + tiny-C pointwise conv (VPU path).

    x_ref: (B_tile, n_segment*C_in, hw_tile)  VMEM, sublane-dense
    w_ref: (C_out, C_in)                      SMEM (scalar reads)
    b_ref: (C_out,)                           SMEM (scalar reads)
    o_ref: (B_tile, t_out*C_out, hw_tile)     VMEM, sublane-dense
    """
    b_tile, in_rows, _ = x_ref.shape
    _, out_rows, _ = o_ref.shape
    c_out, c_in = w_ref.shape
    n_seg = in_rows // c_in
    t_out = out_rows // c_out

    # Hoisted scalar reads (once per invocation): no per-iteration broadcast
    # arrays for the weight columns or the bias.
    w_s = [[w_ref[co, ci] for ci in range(c_in)] for co in range(c_out)]
    b_s = [b_ref[co] for co in range(c_out)]

    for bb in range(b_tile):                       # small static loops
        for j in range(t_out):
            ctr = 2 * j                            # window {2j-1, 2j, 2j+1}
            m = x_ref[bb, ctr * c_in:(ctr + 1) * c_in, :].astype(jnp.float32)
            if ctr - 1 >= 0:
                m = jnp.maximum(
                    m, x_ref[bb, (ctr - 1) * c_in:ctr * c_in, :].astype(jnp.float32))
            if ctr + 1 < n_seg:
                m = jnp.maximum(
                    m, x_ref[bb, (ctr + 1) * c_in:(ctr + 2) * c_in, :].astype(jnp.float32))
            # Pointwise conv on the VPU: scalar(SMEM) x vector FMAs.
            for co in range(c_out):
                acc = m[0:1, :] * w_s[co][0]
                for ci in range(1, c_in):
                    acc = acc + m[ci:ci + 1, :] * w_s[co][ci]
                r = j * c_out + co
                o_ref[bb, r:r + 1, :] = (acc + b_s[co]).astype(o_ref.dtype)


def _fused_kernel_mxu(x_ref, w_ref, b_ref, o_ref):
    """Same fusion, but the channel contraction runs on the MXU (C >= 32).

    x_ref: (B_tile, n_segment*C_in, hw_tile)  VMEM
    w_ref: (C_out, C_in)                      VMEM
    b_ref: (C_out, 1)                         VMEM
    o_ref: (B_tile, t_out*C_out, hw_tile)     VMEM
    """
    b_tile, in_rows, _ = x_ref.shape
    _, out_rows, _ = o_ref.shape
    c_out, c_in = w_ref.shape
    n_seg = in_rows // c_in
    t_out = out_rows // c_out

    w = w_ref[...].astype(jnp.float32)
    b = b_ref[...].astype(jnp.float32)            # (C_out, 1)

    for bb in range(b_tile):
        for j in range(t_out):
            ctr = 2 * j
            m = x_ref[bb, ctr * c_in:(ctr + 1) * c_in, :].astype(jnp.float32)
            if ctr - 1 >= 0:
                m = jnp.maximum(
                    m, x_ref[bb, (ctr - 1) * c_in:ctr * c_in, :].astype(jnp.float32))
            if ctr + 1 < n_seg:
                m = jnp.maximum(
                    m, x_ref[bb, (ctr + 1) * c_in:(ctr + 2) * c_in, :].astype(jnp.float32))
            acc = jnp.dot(w, m, preferred_element_type=jnp.float32) + b
            o_ref[bb, j * c_out:(j + 1) * c_out, :] = acc.astype(o_ref.dtype)


# ----------------------------------------------------------------------------
# Tile / VMEM budgeting
# ----------------------------------------------------------------------------
def _vmem_capacity_bytes():
    try:
        return int(pltpu.get_tpu_info().vmem_capacity_bytes)
    except Exception:
        return 64 * 1024 * 1024  # conservative (v7x per-core physical VMEM)


def _choose_tiles(n_batch, hw, in_rows, out_rows, itemsize, vmem_budget):
    """Pick (b_tile, hw_tile): DMA-efficient blocks, grid >= 4, no lane pad."""
    TARGET_BLOCK_BYTES = 1 << 20   # ~1 MiB input block: ~85%+ of HBM roofline
    MIN_GRID = 4                   # >= 2 steps per TensorCore (v7x megacore)

    if hw % 128 == 0:
        lane_opts = [d for d in range(128, hw + 1, 128) if hw % d == 0]
    else:
        # Lane block == full array dim (always legal): no wrapper pad/slice.
        # TODO(synk): for very large non-128-multiple H*W, switch to ragged
        # lane tiling with an in-kernel masked tail store.
        lane_opts = [hw]
    batch_opts = [d for d in range(1, n_batch + 1) if n_batch % d == 0]

    def grid_size(bt, ht):
        return (n_batch // bt) * (hw // ht)

    def vmem_bytes(bt, ht):
        # double-buffered input + output blocks resident in VMEM
        return 2 * bt * (in_rows + out_rows) * ht * itemsize

    def in_blk_bytes(c):
        return c[0] * in_rows * c[1] * itemsize

    max_grid = n_batch * (hw // min(lane_opts))
    grid_floor = min(MIN_GRID, max_grid)

    cands = [(bt, ht) for bt in batch_opts for ht in lane_opts
             if vmem_bytes(bt, ht) <= vmem_budget]
    if not cands:
        cands = [(1, min(lane_opts))]

    good = [c for c in cands if grid_size(*c) >= grid_floor]
    if good:
        cands = good

    under = [c for c in cands if in_blk_bytes(c) <= TARGET_BLOCK_BYTES]
    if under:
        return max(under, key=in_blk_bytes)
    return min(cands, key=in_blk_bytes)


# ----------------------------------------------------------------------------
# TemporalPool.forward  (pool + net, fused)
# ----------------------------------------------------------------------------
def temporal_pool_forward(x, n_segment, net_weight, net_bias):
    nt, c_in, hgt, wid = x.shape
    assert nt % n_segment == 0, "nt must be divisible by n_segment"
    # PyTorch's .view(nt // 2, c, h, w) only holds for even n_segment
    # (t_out = ceil(n_segment/2)); keep the same contract explicitly.
    assert n_segment % 2 == 0, "TemporalPool requires even n_segment"
    assert net_weight.shape[1] == c_in

    n_batch = nt // n_segment
    t_out = (n_segment - 1) // 2 + 1          # == n_segment // 2 (k=3,s=2,p=1)
    c_out = net_weight.shape[0]
    hw = hgt * wid
    dtype = x.dtype
    itemsize = jnp.dtype(dtype).itemsize

    in_rows = n_segment * c_in
    out_rows = t_out * c_out

    # Free, sublane-dense fold: (nt, C, H, W) -> (n_batch, n_segment*C, H*W).
    xr = x.reshape(n_batch, in_rows, hw)

    cap = _vmem_capacity_bytes()
    vmem_limit = int(min(cap // 2, 32 * 1024 * 1024))
    budget = (vmem_limit * 3) // 4
    b_tile, hw_tile = _choose_tiles(n_batch, hw, in_rows, out_rows,
                                    itemsize, budget)
    # Make sure the chosen (possibly fallback) block always has headroom.
    need = 2 * b_tile * (in_rows + out_rows) * hw_tile * itemsize
    vmem_limit = int(min(max(vmem_limit, need + (4 << 20)), cap))

    grid = (n_batch // b_tile, hw // hw_tile)
    x_spec = pl.BlockSpec((b_tile, in_rows, hw_tile), lambda b, f: (b, 0, f))
    o_spec = pl.BlockSpec((b_tile, out_rows, hw_tile), lambda b, f: (b, 0, f))

    w32 = net_weight.astype(jnp.float32)
    b32 = net_bias.astype(jnp.float32)

    if c_in >= _MXU_MIN_CH:
        kernel = _fused_kernel_mxu
        w_arg = w32
        b_arg = b32.reshape(c_out, 1)
        w_spec = pl.BlockSpec((c_out, c_in), lambda b, f: (0, 0))
        b_spec = pl.BlockSpec((c_out, 1), lambda b, f: (0, 0))
    else:
        kernel = _fused_kernel_small_c
        w_arg = w32
        b_arg = b32
        w_spec = pl.BlockSpec(memory_space=pltpu.MemorySpace.SMEM)
        b_spec = pl.BlockSpec(memory_space=pltpu.MemorySpace.SMEM)

    out = pl.pallas_call(
        kernel,
        out_shape=jax.ShapeDtypeStruct((n_batch, out_rows, hw), dtype),
        grid=grid,
        in_specs=[x_spec, w_spec, b_spec],
        out_specs=o_spec,
        compiler_params=pltpu.CompilerParams(
            dimension_semantics=("parallel", "parallel"),
            vmem_limit_bytes=vmem_limit),
    )(xr, w_arg, b_arg)

    # Free reshape: (n_batch, t_out*C_out, H*W) -> (n_batch*t_out, C_out, H, W)
    # matches PyTorch .transpose(1, 2).contiguous().view(nt // 2, c, h, w).
    return out.reshape(n_batch * t_out, c_out, hgt, wid)


# ----------------------------------------------------------------------------
# Reference (pure JAX) for verification
# ----------------------------------------------------------------------------
def temporal_pool_ref(x, n_segment):
    nt, c, h, w = x.shape
    n_batch = nt // n_segment
    xr = x.reshape(n_batch, n_segment, c, h, w)
    pad = jnp.full((n_batch, 1, c, h, w), -jnp.inf, x.dtype)
    xp = jnp.concatenate([pad, xr, pad], axis=1)
    t_out = (n_segment - 1) // 2 + 1
    pooled = jnp.stack(
        [xp[:, 2 * j:2 * j + 3].max(axis=1) for j in range(t_out)], axis=1)
    return pooled.reshape(n_batch * t_out, c, h, w)


def forward_ref(x, n_segment, weight, bias):
    p = temporal_pool_ref(x, n_segment)
    return jnp.einsum('nchw,oc->nohw', p, weight) + bias[None, :, None, None]


if __name__ == "__main__":
    key = jax.random.PRNGKey(0)
    k1, k2, k3 = jax.random.split(key, 3)

    n_segment = 8
    nt, c, h, w = 16, 4, 16, 16        # nt = n_batch * n_segment = 2 * 8
    x = jax.random.normal(k1, (nt, c, h, w), dtype=jnp.float32)

    # deterministic "net" params (1x1 conv): weight (C_out, C_in), bias (C_out,)
    weight = jax.random.normal(k2, (c, c), dtype=jnp.float32) / math.sqrt(c)
    bias = 0.01 * jax.random.normal(k3, (c,), dtype=jnp.float32)

    y = temporal_pool_forward(x, n_segment, weight, bias)
    y = jax.block_until_ready(y)

    y_ref = forward_ref(x, n_segment, weight, bias)
    assert y.shape == (nt // 2, c, h, w), y.shape
    assert jnp.allclose(y, y_ref, atol=1e-5, rtol=1e-5), "mismatch vs reference"

    print("KERNEL_OK")
</pallas_src>

<mosaic_0001>
module attributes {stable_mosaic.version = 11 : i64} {
  func.func @_fused_kernel_small_c(%arg0: i32, %arg1: i32, %arg2: memref<1x32x128xf32, #tpu.memory_space<vmem>>, %arg3: memref<4x4xf32, #tpu.memory_space<smem>>, %arg4: memref<4xf32, #tpu.memory_space<smem>>, %arg5: memref<1x16x128xf32, #tpu.memory_space<vmem>>) attributes {dimension_semantics = [#tpu.dimension_semantics<parallel>, #tpu.dimension_semantics<parallel>], iteration_bounds = array<i64: 2, 2>, scalar_prefetch = 0 : i64, scratch_operands = 0 : i64, tpu.core_type = #tpu.core_type<tc>, window_params = [{transform_indices = @transform_0, window_bounds = array<i64: 1, 32, 128>}, {transform_indices = @transform_1, window_bounds = array<i64: 4, 4>}, {transform_indices = @transform_2, window_bounds = array<i64: 4>}, {transform_indices = @transform_3, window_bounds = array<i64: 1, 16, 128>}]} {
    %c0 = arith.constant 0 : index
    %c0_0 = arith.constant 0 : index
    %0 = memref.load %arg3[%c0, %c0_0] : memref<4x4xf32, #tpu.memory_space<smem>>
    %c0_1 = arith.constant 0 : index
    %c1 = arith.constant 1 : index
    %1 = memref.load %arg3[%c0_1, %c1] : memref<4x4xf32, #tpu.memory_space<smem>>
    %c0_2 = arith.constant 0 : index
    %c2 = arith.constant 2 : index
    %2 = memref.load %arg3[%c0_2, %c2] : memref<4x4xf32, #tpu.memory_space<smem>>
    %c0_3 = arith.constant 0 : index
    %c3 = arith.constant 3 : index
    %3 = memref.load %arg3[%c0_3, %c3] : memref<4x4xf32, #tpu.memory_space<smem>>
    %c1_4 = arith.constant 1 : index
    %c0_5 = arith.constant 0 : index
    %4 = memref.load %arg3[%c1_4, %c0_5] : memref<4x4xf32, #tpu.memory_space<smem>>
    %c1_6 = arith.constant 1 : index
    %c1_7 = arith.constant 1 : index
    %5 = memref.load %arg3[%c1_6, %c1_7] : memref<4x4xf32, #tpu.memory_space<smem>>
    %c1_8 = arith.constant 1 : index
    %c2_9 = arith.constant 2 : index
    %6 = memref.load %arg3[%c1_8, %c2_9] : memref<4x4xf32, #tpu.memory_space<smem>>
    %c1_10 = arith.constant 1 : index
    %c3_11 = arith.constant 3 : index
    %7 = memref.load %arg3[%c1_10, %c3_11] : memref<4x4xf32, #tpu.memory_space<smem>>
    %c2_12 = arith.constant 2 : index
    %c0_13 = arith.constant 0 : index
    %8 = memref.load %arg3[%c2_12, %c0_13] : memref<4x4xf32, #tpu.memory_space<smem>>
    %c2_14 = arith.constant 2 : index
    %c1_15 = arith.constant 1 : index
    %9 = memref.load %arg3[%c2_14, %c1_15] : memref<4x4xf32, #tpu.memory_space<smem>>
    %c2_16 = arith.constant 2 : index
    %c2_17 = arith.constant 2 : index
    %10 = memref.load %arg3[%c2_16, %c2_17] : memref<4x4xf32, #tpu.memory_space<smem>>
    %c2_18 = arith.constant 2 : index
    %c3_19 = arith.constant 3 : index
    %11 = memref.load %arg3[%c2_18, %c3_19] : memref<4x4xf32, #tpu.memory_space<smem>>
    %c3_20 = arith.constant 3 : index
    %c0_21 = arith.constant 0 : index
    %12 = memref.load %arg3[%c3_20, %c0_21] : memref<4x4xf32, #tpu.memory_space<smem>>
    %c3_22 = arith.constant 3 : index
    %c1_23 = arith.constant 1 : index
    %13 = memref.load %arg3[%c3_22, %c1_23] : memref<4x4xf32, #tpu.memory_space<smem>>
    %c3_24 = arith.constant 3 : index
    %c2_25 = arith.constant 2 : index
    %14 = memref.load %arg3[%c3_24, %c2_25] : memref<4x4xf32, #tpu.memory_space<smem>>
    %c3_26 = arith.constant 3 : index
    %c3_27 = arith.constant 3 : index
    %15 = memref.load %arg3[%c3_26, %c3_27] : memref<4x4xf32, #tpu.memory_space<smem>>
    %c0_28 = arith.constant 0 : index
    %16 = memref.load %arg4[%c0_28] : memref<4xf32, #tpu.memory_space<smem>>
    %c1_29 = arith.constant 1 : index
    %17 = memref.load %arg4[%c1_29] : memref<4xf32, #tpu.memory_space<smem>>
    %c2_30 = arith.constant 2 : index
    %18 = memref.load %arg4[%c2_30] : memref<4xf32, #tpu.memory_space<smem>>
    %c3_31 = arith.constant 3 : index
    %19 = memref.load %arg4[%c3_31] : memref<4xf32, #tpu.memory_space<smem>>
    %c0_32 = arith.constant 0 : index
    %c0_33 = arith.constant 0 : index
    %c0_34 = arith.constant 0 : index
    %20 = vector.load %arg2[%c0_32, %c0_33, %c0_34] : memref<1x32x128xf32, #tpu.memory_space<vmem>>, vector<1x4x128xf32>
    %21 = vector.shape_cast %20 : vector<1x4x128xf32> to vector<4x128xf32>
    %c0_35 = arith.constant 0 : index
    %c4 = arith.constant 4 : index
    %c0_36 = arith.constant 0 : index
    %22 = vector.load %arg2[%c0_35, %c4, %c0_36] : memref<1x32x128xf32, #tpu.memory_space<vmem>>, vector<1x4x128xf32>
    %23 = vector.shape_cast %22 : vector<1x4x128xf32> to vector<4x128xf32>
    %24 = arith.maximumf %21, %23 : vector<4x128xf32>
    %25 = vector.extract_strided_slice %24 {offsets = [0, 0], sizes = [1, 128], strides = [1, 1]} : vector<4x128xf32> to vector<1x128xf32>
    %26 = vector.broadcast %0 : f32 to vector<1x128xf32>
    %27 = arith.mulf %25, %26 : vector<1x128xf32>
    %28 = vector.extract_strided_slice %24 {offsets = [1, 0], sizes = [1, 128], strides = [1, 1]} : vector<4x128xf32> to vector<1x128xf32>
    %29 = vector.broadcast %1 : f32 to vector<1x128xf32>
    %30 = arith.mulf %28, %29 : vector<1x128xf32>
    %31 = arith.addf %27, %30 : vector<1x128xf32>
    %32 = vector.extract_strided_slice %24 {offsets = [2, 0], sizes = [1, 128], strides = [1, 1]} : vector<4x128xf32> to vector<1x128xf32>
    %33 = vector.broadcast %2 : f32 to vector<1x128xf32>
    %34 = arith.mulf %32, %33 : vector<1x128xf32>
    %35 = arith.addf %31, %34 : vector<1x128xf32>
    %36 = vector.extract_strided_slice %24 {offsets = [3, 0], sizes = [1, 128], strides = [1, 1]} : vector<4x128xf32> to vector<1x128xf32>
    %37 = vector.broadcast %3 : f32 to vector<1x128xf32>
    %38 = arith.mulf %36, %37 : vector<1x128xf32>
    %39 = arith.addf %35, %38 : vector<1x128xf32>
    %40 = vector.broadcast %16 : f32 to vector<1x128xf32>
    %41 = arith.addf %39, %40 : vector<1x128xf32>
    %c0_37 = arith.constant 0 : index
    %c0_38 = arith.constant 0 : index
    %c0_39 = arith.constant 0 : index
    %42 = vector.load %arg5[%c0_37, %c0_38, %c0_39] : memref<1x16x128xf32, #tpu.memory_space<vmem>>, vector<1x1x128xf32>
    %43 = vector.shape_cast %42 : vector<1x1x128xf32> to vector<1x128xf32>
    %44 = vector.shape_cast %41 : vector<1x128xf32> to vector<1x1x128xf32>
    tpu.vector_store %arg5[%c0_37, %c0_38, %c0_39], %44 {strides = array<i32>} : memref<1x16x128xf32, #tpu.memory_space<vmem>>, vector<1x1x128xf32>,
    %45 = vector.extract_strided_slice %24 {offsets = [0, 0], sizes = [1, 128], strides = [1, 1]} : vector<4x128xf32> to vector<1x128xf32>
    %46 = vector.broadcast %4 : f32 to vector<1x128xf32>
    %47 = arith.mulf %45, %46 : vector<1x128xf32>
    %48 = vector.extract_strided_slice %24 {offsets = [1, 0], sizes = [1, 128], strides = [1, 1]} : vector<4x128xf32> to vector<1x128xf32>
    %49 = vector.broadcast %5 : f32 to vector<1x128xf32>
    %50 = arith.mulf %48, %49 : vector<1x128xf32>
    %51 = arith.addf %47, %50 : vector<1x128xf32>
    %52 = vector.extract_strided_slice %24 {offsets = [2, 0], sizes = [1, 128], strides = [1, 1]} : vector<4x128xf32> to vector<1x128xf32>
    %53 = vector.broadcast %6 : f32 to vector<1x128xf32>
    %54 = arith.mulf %52, %53 : vector<1x128xf32>
    %55 = arith.addf %51, %54 : vector<1x128xf32>
    %56 = vector.extract_strided_slice %24 {offsets = [3, 0], sizes = [1, 128], strides = [1, 1]} : vector<4x128xf32> to vector<1x128xf32>
    %57 = vector.broadcast %7 : f32 to vector<1x128xf32>
    %58 = arith.mulf %56, %57 : vector<1x128xf32>
    %59 = arith.addf %55, %58 : vector<1x128xf32>
    %60 = vector.broadcast %17 : f32 to vector<1x128xf32>
    %61 = arith.addf %59, %60 : vector<1x128xf32>
    %c0_40 = arith.constant 0 : index
    %c1_41 = arith.constant 1 : index
    %c0_42 = arith.constant 0 : index
    %62 = vector.load %arg5[%c0_40, %c1_41, %c0_42] : memref<1x16x128xf32, #tpu.memory_space<vmem>>, vector<1x1x128xf32>
    %63 = vector.shape_cast %62 : vector<1x1x128xf32> to vector<1x128xf32>
    %64 = vector.shape_cast %61 : vector<1x128xf32> to vector<1x1x128xf32>
    tpu.vector_store %arg5[%c0_40, %c1_41, %c0_42], %64 {strides = array<i32>} : memref<1x16x128xf32, #tpu.memory_space<vmem>>, vector<1x1x128xf32>,
    %65 = vector.extract_strided_slice %24 {offsets = [0, 0], sizes = [1, 128], strides = [1, 1]} : vector<4x128xf32> to vector<1x128xf32>
    %66 = vector.broadcast %8 : f32 to vector<1x128xf32>
    %67 = arith.mulf %65, %66 : vector<1x128xf32>
    %68 = vector.extract_strided_slice %24 {offsets = [1, 0], sizes = [1, 128], strides = [1, 1]} : vector<4x128xf32> to vector<1x128xf32>
    %69 = vector.broadcast %9 : f32 to vector<1x128xf32>
    %70 = arith.mulf %68, %69 : vector<1x128xf32>
    %71 = arith.addf %67, %70 : vector<1x128xf32>
    %72 = vector.extract_strided_slice %24 {offsets = [2, 0], sizes = [1, 128], strides = [1, 1]} : vector<4x128xf32> to vector<1x128xf32>
    %73 = vector.broadcast %10 : f32 to vector<1x128xf32>
    %74 = arith.mulf %72, %73 : vector<1x128xf32>
    %75 = arith.addf %71, %74 : vector<1x128xf32>
    %76 = vector.extract_strided_slice %24 {offsets = [3, 0], sizes = [1, 128], strides = [1, 1]} : vector<4x128xf32> to vector<1x128xf32>
    %77 = vector.broadcast %11 : f32 to vector<1x128xf32>
    %78 = arith.mulf %76, %77 : vector<1x128xf32>
    %79 = arith.addf %75, %78 : vector<1x128xf32>
    %80 = vector.broadcast %18 : f32 to vector<1x128xf32>
    %81 = arith.addf %79, %80 : vector<1x128xf32>
    %c0_43 = arith.constant 0 : index
    %c2_44 = arith.constant 2 : index
    %c0_45 = arith.constant 0 : index
    %82 = vector.load %arg5[%c0_43, %c2_44, %c0_45] : memref<1x16x128xf32, #tpu.memory_space<vmem>>, vector<1x1x128xf32>
    %83 = vector.shape_cast %82 : vector<1x1x128xf32> to vector<1x128xf32>
    %84 = vector.shape_cast %81 : vector<1x128xf32> to vector<1x1x128xf32>
    tpu.vector_store %arg5[%c0_43, %c2_44, %c0_45], %84 {strides = array<i32>} : memref<1x16x128xf32, #tpu.memory_space<vmem>>, vector<1x1x128xf32>,
    %85 = vector.extract_strided_slice %24 {offsets = [0, 0], sizes = [1, 128], strides = [1, 1]} : vector<4x128xf32> to vector<1x128xf32>
    %86 = vector.broadcast %12 : f32 to vector<1x128xf32>
    %87 = arith.mulf %85, %86 : vector<1x128xf32>
    %88 = vector.extract_strided_slice %24 {offsets = [1, 0], sizes = [1, 128], strides = [1, 1]} : vector<4x128xf32> to vector<1x128xf32>
    %89 = vector.broadcast %13 : f32 to vector<1x128xf32>
    %90 = arith.mulf %88, %89 : vector<1x128xf32>
    %91 = arith.addf %87, %90 : vector<1x128xf32>
    %92 = vector.extract_strided_slice %24 {offsets = [2, 0], sizes = [1, 128], strides = [1, 1]} : vector<4x128xf32> to vector<1x128xf32>
    %93 = vector.broadcast %14 : f32 to vector<1x128xf32>
    %94 = arith.mulf %92, %93 : vector<1x128xf32>
    %95 = arith.addf %91, %94 : vector<1x128xf32>
    %96 = vector.extract_strided_slice %24 {offsets = [3, 0], sizes = [1, 128], strides = [1, 1]} : vector<4x128xf32> to vector<1x128xf32>
    %97 = vector.broadcast %15 : f32 to vector<1x128xf32>
    %98 = arith.mulf %96, %97 : vector<1x128xf32>
    %99 = arith.addf %95, %98 : vector<1x128xf32>
    %100 = vector.broadcast %19 : f32 to vector<1x128xf32>
    %101 = arith.addf %99, %100 : vector<1x128xf32>
    %c0_46 = arith.constant 0 : index
    %c3_47 = arith.constant 3 : index
    %c0_48 = arith.constant 0 : index
    %102 = vector.load %arg5[%c0_46, %c3_47, %c0_48] : memref<1x16x128xf32, #tpu.memory_space<vmem>>, vector<1x1x128xf32>
    %103 = vector.shape_cast %102 : vector<1x1x128xf32> to vector<1x128xf32>
    %104 = vector.shape_cast %101 : vector<1x128xf32> to vector<1x1x128xf32>
    tpu.vector_store %arg5[%c0_46, %c3_47, %c0_48], %104 {strides = array<i32>} : memref<1x16x128xf32, #tpu.memory_space<vmem>>, vector<1x1x128xf32>,
    %c0_49 = arith.constant 0 : index
    %c8 = arith.constant 8 : index
    %c0_50 = arith.constant 0 : index
    %105 = vector.load %arg2[%c0_49, %c8, %c0_50] : memref<1x32x128xf32, #tpu.memory_space<vmem>>, vector<1x4x128xf32>
    %106 = vector.shape_cast %105 : vector<1x4x128xf32> to vector<4x128xf32>
    %c0_51 = arith.constant 0 : index
    %c4_52 = arith.constant 4 : index
    %c0_53 = arith.constant 0 : index
    %107 = vector.load %arg2[%c0_51, %c4_52, %c0_53] : memref<1x32x128xf32, #tpu.memory_space<vmem>>, vector<1x4x128xf32>
    %108 = vector.shape_cast %107 : vector<1x4x128xf32> to vector<4x128xf32>
    %109 = arith.maximumf %106, %108 : vector<4x128xf32>
    %c0_54 = arith.constant 0 : index
    %c12 = arith.constant 12 : index
    %c0_55 = arith.constant 0 : index
    %110 = vector.load %arg2[%c0_54, %c12, %c0_55] : memref<1x32x128xf32, #tpu.memory_space<vmem>>, vector<1x4x128xf32>
    %111 = vector.shape_cast %110 : vector<1x4x128xf32> to vector<4x128xf32>
    %112 = arith.maximumf %109, %111 : vector<4x128xf32>
    %113 = vector.extract_strided_slice %112 {offsets = [0, 0], sizes = [1, 128], strides = [1, 1]} : vector<4x128xf32> to vector<1x128xf32>
    %114 = vector.broadcast %0 : f32 to vector<1x128xf32>
    %115 = arith.mulf %113, %114 : vector<1x128xf32>
    %116 = vector.extract_strided_slice %112 {offsets = [1, 0], sizes = [1, 128], strides = [1, 1]} : vector<4x128xf32> to vector<1x128xf32>
    %117 = vector.broadcast %1 : f32 to vector<1x128xf32>
    %118 = arith.mulf %116, %117 : vector<1x128xf32>
    %119 = arith.addf %115, %118 : vector<1x128xf32>
    %120 = vector.extract_strided_slice %112 {offsets = [2, 0], sizes = [1, 128], strides = [1, 1]} : vector<4x128xf32> to vector<1x128xf32>
    %121 = vector.broadcast %2 : f32 to vector<1x128xf32>
    %122 = arith.mulf %120, %121 : vector<1x128xf32>
    %123 = arith.addf %119, %122 : vector<1x128xf32>
    %124 = vector.extract_strided_slice %112 {offsets = [3, 0], sizes = [1, 128], strides = [1, 1]} : vector<4x128xf32> to vector<1x128xf32>
    %125 = vector.broadcast %3 : f32 to vector<1x128xf32>
    %126 = arith.mulf %124, %125 : vector<1x128xf32>
    %127 = arith.addf %123, %126 : vector<1x128xf32>
    %128 = vector.broadcast %16 : f32 to vector<1x128xf32>
    %129 = arith.addf %127, %128 : vector<1x128xf32>
    %c0_56 = arith.constant 0 : index
    %c4_57 = arith.constant 4 : index
    %c0_58 = arith.constant 0 : index
    %130 = vector.load %arg5[%c0_56, %c4_57, %c0_58] : memref<1x16x128xf32, #tpu.memory_space<vmem>>, vector<1x1x128xf32>
    %131 = vector.shape_cast %130 : vector<1x1x128xf32> to vector<1x128xf32>
    %132 = vector.shape_cast %129 : vector<1x128xf32> to vector<1x1x128xf32>
    tpu.vector_store %arg5[%c0_56, %c4_57, %c0_58], %132 {strides = array<i32>} : memref<1x16x128xf32, #tpu.memory_space<vmem>>, vector<1x1x128xf32>,
    %133 = vector.extract_strided_slice %112 {offsets = [0, 0], sizes = [1, 128], strides = [1, 1]} : vector<4x128xf32> to vector<1x128xf32>
    %134 = vector.broadcast %4 : f32 to vector<1x128xf32>
    %135 = arith.mulf %133, %134 : vector<1x128xf32>
    %136 = vector.extract_strided_slice %112 {offsets = [1, 0], sizes = [1, 128], strides = [1, 1]} : vector<4x128xf32> to vector<1x128xf32>
    %137 = vector.broadcast %5 : f32 to vector<1x128xf32>
    %138 = arith.mulf %136, %137 : vector<1x128xf32>
    %139 = arith.addf %135, %138 : vector<1x128xf32>
    %140 = vector.extract_strided_slice %112 {offsets = [2, 0], sizes = [1, 128], strides = [1, 1]} : vector<4x128xf32> to vector<1x128xf32>
    %141 = vector.broadcast %6 : f32 to vector<1x128xf32>
    %142 = arith.mulf %140, %141 : vector<1x128xf32>
    %143 = arith.addf %139, %142 : vector<1x128xf32>
    %144 = vector.extract_strided_slice %112 {offsets = [3, 0], sizes = [1, 128], strides = [1, 1]} : vector<4x128xf32> to vector<1x128xf32>
    %145 = vector.broadcast %7 : f32 to vector<1x128xf32>
    %146 = arith.mulf %144, %145 : vector<1x128xf32>
    %147 = arith.addf %143, %146 : vector<1x128xf32>
    %148 = vector.broadcast %17 : f32 to vector<1x128xf32>
    %149 = arith.addf %147, %148 : vector<1x128xf32>
    %c0_59 = arith.constant 0 : index
    %c5 = arith.constant 5 : index
    %c0_60 = arith.constant 0 : index
    %150 = vector.load %arg5[%c0_59, %c5, %c0_60] : memref<1x16x128xf32, #tpu.memory_space<vmem>>, vector<1x1x128xf32>
    %151 = vector.shape_cast %150 : vector<1x1x128xf32> to vector<1x128xf32>
    %152 = vector.shape_cast %149 : vector<1x128xf32> to vector<1x1x128xf32>
    tpu.vector_store %arg5[%c0_59, %c5, %c0_60], %152 {strides = array<i32>} : memref<1x16x128xf32, #tpu.memory_space<vmem>>, vector<1x1x128xf32>,
    %153 = vector.extract_strided_slice %112 {offsets = [0, 0], sizes = [1, 128], strides = [1, 1]} : vector<4x128xf32> to vector<1x128xf32>
    %154 = vector.broadcast %8 : f32 to vector<1x128xf32>
    %155 = arith.mulf %153, %154 : vector<1x128xf32>
    %156 = vector.extract_strided_slice %112 {offsets = [1, 0], sizes = [1, 128], strides = [1, 1]} : vector<4x128xf32> to vector<1x128xf32>
    %157 = vector.broadcast %9 : f32 to vector<1x128xf32>
    %158 = arith.mulf %156, %157 : vector<1x128xf32>
    %159 = arith.addf %155, %158 : vector<1x128xf32>
    %160 = vector.extract_strided_slice %112 {offsets = [2, 0], sizes = [1, 128], strides = [1, 1]} : vector<4x128xf32> to vector<1x128xf32>
    %161 = vector.broadcast %10 : f32 to vector<1x128xf32>
    %162 = arith.mulf %160, %161 : vector<1x128xf32>
    %163 = arith.addf %159, %162 : vector<1x128xf32>
    %164 = vector.extract_strided_slice %112 {offsets = [3, 0], sizes = [1, 128], strides = [1, 1]} : vector<4x128xf32> to vector<1x128xf32>
    %165 = vector.broadcast %11 : f32 to vector<1x128xf32>
    %166 = arith.mulf %164, %165 : vector<1x128xf32>
    %167 = arith.addf %163, %166 : vector<1x128xf32>
    %168 = vector.broadcast %18 : f32 to vector<1x128xf32>
    %169 = arith.addf %167, %168 : vector<1x128xf32>
    %c0_61 = arith.constant 0 : index
    %c6 = arith.constant 6 : index
    %c0_62 = arith.constant 0 : index
    %170 = vector.load %arg5[%c0_61, %c6, %c0_62] : memref<1x16x128xf32, #tpu.memory_space<vmem>>, vector<1x1x128xf32>
    %171 = vector.shape_cast %170 : vector<1x1x128xf32> to vector<1x128xf32>
    %172 = vector.shape_cast %169 : vector<1x128xf32> to vector<1x1x128xf32>
    tpu.vector_store %arg5[%c0_61, %c6, %c0_62], %172 {strides = array<i32>} : memref<1x16x128xf32, #tpu.memory_space<vmem>>, vector<1x1x128xf32>,
    %173 = vector.extract_strided_slice %112 {offsets = [0, 0], sizes = [1, 128], strides = [1, 1]} : vector<4x128xf32> to vector<1x128xf32>
    %174 = vector.broadcast %12 : f32 to vector<1x128xf32>
    %175 = arith.mulf %173, %174 : vector<1x128xf32>
    %176 = vector.extract_strided_slice %112 {offsets = [1, 0], sizes = [1, 128], strides = [1, 1]} : vector<4x128xf32> to vector<1x128xf32>
    %177 = vector.broadcast %13 : f32 to vector<1x128xf32>
    %178 = arith.mulf %176, %177 : vector<1x128xf32>
    %179 = arith.addf %175, %178 : vector<1x128xf32>
    %180 = vector.extract_strided_slice %112 {offsets = [2, 0], sizes = [1, 128], strides = [1, 1]} : vector<4x128xf32> to vector<1x128xf32>
    %181 = vector.broadcast %14 : f32 to vector<1x128xf32>
    %182 = arith.mulf %180, %181 : vector<1x128xf32>
    %183 = arith.addf %179, %182 : vector<1x128xf32>
    %184 = vector.extract_strided_slice %112 {offsets = [3, 0], sizes = [1, 128], strides = [1, 1]} : vector<4x128xf32> to vector<1x128xf32>
    %185 = vector.broadcast %15 : f32 to vector<1x128xf32>
    %186 = arith.mulf %184, %185 : vector<1x128xf32>
    %187 = arith.addf %183, %186 : vector<1x128xf32>
    %188 = vector.broadcast %19 : f32 to vector<1x128xf32>
    %189 = arith.addf %187, %188 : vector<1x128xf32>
    %c0_63 = arith.constant 0 : index
    %c7 = arith.constant 7 : index
    %c0_64 = arith.constant 0 : index
    %190 = vector.load %arg5[%c0_63, %c7, %c0_64] : memref<1x16x128xf32, #tpu.memory_space<vmem>>, vector<1x1x128xf32>
    %191 = vector.shape_cast %190 : vector<1x1x128xf32> to vector<1x128xf32>
    %192 = vector.shape_cast %189 : vector<1x128xf32> to vector<1x1x128xf32>
    tpu.vector_store %arg5[%c0_63, %c7, %c0_64], %192 {strides = array<i32>} : memref<1x16x128xf32, #tpu.memory_space<vmem>>, vector<1x1x128xf32>,
    %c0_65 = arith.constant 0 : index
    %c16 = arith.constant 16 : index
    %c0_66 = arith.constant 0 : index
    %193 = vector.load %arg2[%c0_65, %c16, %c0_66] : memref<1x32x128xf32, #tpu.memory_space<vmem>>, vector<1x4x128xf32>
    %194 = vector.shape_cast %193 : vector<1x4x128xf32> to vector<4x128xf32>
    %c0_67 = arith.constant 0 : index
    %c12_68 = arith.constant 12 : index
    %c0_69 = arith.constant 0 : index
    %195 = vector.load %arg2[%c0_67, %c12_68, %c0_69] : memref<1x32x128xf32, #tpu.memory_space<vmem>>, vector<1x4x128xf32>
    %196 = vector.shape_cast %195 : vector<1x4x128xf32> to vector<4x128xf32>
    %197 = arith.maximumf %194, %196 : vector<4x128xf32>
    %c0_70 = arith.constant 0 : index
    %c20 = arith.constant 20 : index
    %c0_71 = arith.constant 0 : index
    %198 = vector.load %arg2[%c0_70, %c20, %c0_71] : memref<1x32x128xf32, #tpu.memory_space<vmem>>, vector<1x4x128xf32>
    %199 = vector.shape_cast %198 : vector<1x4x128xf32> to vector<4x128xf32>
    %200 = arith.maximumf %197, %199 : vector<4x128xf32>
    %201 = vector.extract_strided_slice %200 {offsets = [0, 0], sizes = [1, 128], strides = [1, 1]} : vector<4x128xf32> to vector<1x128xf32>
    %202 = vector.broadcast %0 : f32 to vector<1x128xf32>
    %203 = arith.mulf %201, %202 : vector<1x128xf32>
    %204 = vector.extract_strided_slice %200 {offsets = [1, 0], sizes = [1, 128], strides = [1, 1]} : vector<4x128xf32> to vector<1x128xf32>
    %205 = vector.broadcast %1 : f32 to vector<1x128xf32>
    %206 = arith.mulf %204, %205 : vector<1x128xf32>
    %207 = arith.addf %203, %206 : vector<1x128xf32>
    %208 = vector.extract_strided_slice %200 {offsets = [2, 0], sizes = [1, 128], strides = [1, 1]} : vector<4x128xf32> to vector<1x128xf32>
    %209 = vector.broadcast %2 : f32 to vector<1x128xf32>
    %210 = arith.mulf %208, %209 : vector<1x128xf32>
    %211 = arith.addf %207, %210 : vector<1x128xf32>
    %212 = vector.extract_strided_slice %200 {offsets = [3, 0], sizes = [1, 128], strides = [1, 1]} : vector<4x128xf32> to vector<1x128xf32>
    %213 = vector.broadcast %3 : f32 to vector<1x128xf32>
    %214 = arith.mulf %212, %213 : vector<1x128xf32>
    %215 = arith.addf %211, %214 : vector<1x128xf32>
    %216 = vector.broadcast %16 : f32 to vector<1x128xf32>
    %217 = arith.addf %215, %216 : vector<1x128xf32>
    %c0_72 = arith.constant 0 : index
    %c8_73 = arith.constant 8 : index
    %c0_74 = arith.constant 0 : index
    %218 = vector.load %arg5[%c0_72, %c8_73, %c0_74] : memref<1x16x128xf32, #tpu.memory_space<vmem>>, vector<1x1x128xf32>
    %219 = vector.shape_cast %218 : vector<1x1x128xf32> to vector<1x128xf32>
    %220 = vector.shape_cast %217 : vector<1x128xf32> to vector<1x1x128xf32>
    tpu.vector_store %arg5[%c0_72, %c8_73, %c0_74], %220 {strides = array<i32>} : memref<1x16x128xf32, #tpu.memory_space<vmem>>, vector<1x1x128xf32>,
    %221 = vector.extract_strided_slice %200 {offsets = [0, 0], sizes = [1, 128], strides = [1, 1]} : vector<4x128xf32> to vector<1x128xf32>
    %222 = vector.broadcast %4 : f32 to vector<1x128xf32>
    %223 = arith.mulf %221, %222 : vector<1x128xf32>
    %224 = vector.extract_strided_slice %200 {offsets = [1, 0], sizes = [1, 128], strides = [1, 1]} : vector<4x128xf32> to vector<1x128xf32>
    %225 = vector.broadcast %5 : f32 to vector<1x128xf32>
    %226 = arith.mulf %224, %225 : vector<1x128xf32>
    %227 = arith.addf %223, %226 : vector<1x128xf32>
    %228 = vector.extract_strided_slice %200 {offsets = [2, 0], sizes = [1, 128], strides = [1, 1]} : vector<4x128xf32> to vector<1x128xf32>
    %229 = vector.broadcast %6 : f32 to vector<1x128xf32>
    %230 = arith.mulf %228, %229 : vector<1x128xf32>
    %231 = arith.addf %227, %230 : vector<1x128xf32>
    %232 = vector.extract_strided_slice %200 {offsets = [3, 0], sizes = [1, 128], strides = [1, 1]} : vector<4x128xf32> to vector<1x128xf32>
    %233 = vector.broadcast %7 : f32 to vector<1x128xf32>
    %234 = arith.mulf %232, %233 : vector<1x128xf32>
    %235 = arith.addf %231, %234 : vector<1x128xf32>
    %236 = vector.broadcast %17 : f32 to vector<1x128xf32>
    %237 = arith.addf %235, %236 : vector<1x128xf32>
    %c0_75 = arith.constant 0 : index
    %c9 = arith.constant 9 : index
    %c0_76 = arith.constant 0 : index
    %238 = vector.load %arg5[%c0_75, %c9, %c0_76] : memref<1x16x128xf32, #tpu.memory_space<vmem>>, vector<1x1x128xf32>
    %239 = vector.shape_cast %238 : vector<1x1x128xf32> to vector<1x128xf32>
    %240 = vector.shape_cast %237 : vector<1x128xf32> to vector<1x1x128xf32>
    tpu.vector_store %arg5[%c0_75, %c9, %c0_76], %240 {strides = array<i32>} : memref<1x16x128xf32, #tpu.memory_space<vmem>>, vector<1x1x128xf32>,
    %241 = vector.extract_strided_slice %200 {offsets = [0, 0], sizes = [1, 128], strides = [1, 1]} : vector<4x128xf32> to vector<1x128xf32>
    %242 = vector.broadcast %8 : f32 to vector<1x128xf32>
    %243 = arith.mulf %241, %242 : vector<1x128xf32>
    %244 = vector.extract_strided_slice %200 {offsets = [1, 0], sizes = [1, 128], strides = [1, 1]} : vector<4x128xf32> to vector<1x128xf32>
    %245 = vector.broadcast %9 : f32 to vector<1x128xf32>
    %246 = arith.mulf %244, %245 : vector<1x128xf32>
    %247 = arith.addf %243, %246 : vector<1x128xf32>
    %248 = vector.extract_strided_slice %200 {offsets = [2, 0], sizes = [1, 128], strides = [1, 1]} : vector<4x128xf32> to vector<1x128xf32>
    %249 = vector.broadcast %10 : f32 to vector<1x128xf32>
    %250 = arith.mulf %248, %249 : vector<1x128xf32>
    %251 = arith.addf %247, %250 : vector<1x128xf32>
    %252 = vector.extract_strided_slice %200 {offsets = [3, 0], sizes = [1, 128], strides = [1, 1]} : vector<4x128xf32> to vector<1x128xf32>
    %253 = vector.broadcast %11 : f32 to vector<1x128xf32>
    %254 = arith.mulf %252, %253 : vector<1x128xf32>
    %255 = arith.addf %251, %254 : vector<1x128xf32>
    %256 = vector.broadcast %18 : f32 to vector<1x128xf32>
    %257 = arith.addf %255, %256 : vector<1x128xf32>
    %c0_77 = arith.constant 0 : index
    %c10 = arith.constant 10 : index
    %c0_78 = arith.constant 0 : index
    %258 = vector.load %arg5[%c0_77, %c10, %c0_78] : memref<1x16x128xf32, #tpu.memory_space<vmem>>, vector<1x1x128xf32>
    %259 = vector.shape_cast %258 : vector<1x1x128xf32> to vector<1x128xf32>
    %260 = vector.shape_cast %257 : vector<1x128xf32> to vector<1x1x128xf32>
    tpu.vector_store %arg5[%c0_77, %c10, %c0_78], %260 {strides = array<i32>} : memref<1x16x128xf32, #tpu.memory_space<vmem>>, vector<1x1x128xf32>,
    %261 = vector.extract_strided_slice %200 {offsets = [0, 0], sizes = [1, 128], strides = [1, 1]} : vector<4x128xf32> to vector<1x128xf32>
    %262 = vector.broadcast %12 : f32 to vector<1x128xf32>
    %263 = arith.mulf %261, %262 : vector<1x128xf32>
    %264 = vector.extract_strided_slice %200 {offsets = [1, 0], sizes = [1, 128], strides = [1, 1]} : vector<4x128xf32> to vector<1x128xf32>
    %265 = vector.broadcast %13 : f32 to vector<1x128xf32>
    %266 = arith.mulf %264, %265 : vector<1x128xf32>
    %267 = arith.addf %263, %266 : vector<1x128xf32>
    %268 = vector.extract_strided_slice %200 {offsets = [2, 0], sizes = [1, 128], strides = [1, 1]} : vector<4x128xf32> to vector<1x128xf32>
    %269 = vector.broadcast %14 : f32 to vector<1x128xf32>
    %270 = arith.mulf %268, %269 : vector<1x128xf32>
    %271 = arith.addf %267, %270 : vector<1x128xf32>
    %272 = vector.extract_strided_slice %200 {offsets = [3, 0], sizes = [1, 128], strides = [1, 1]} : vector<4x128xf32> to vector<1x128xf32>
    %273 = vector.broadcast %15 : f32 to vector<1x128xf32>
    %274 = arith.mulf %272, %273 : vector<1x128xf32>
    %275 = arith.addf %271, %274 : vector<1x128xf32>
    %276 = vector.broadcast %19 : f32 to vector<1x128xf32>
    %277 = arith.addf %275, %276 : vector<1x128xf32>
    %c0_79 = arith.constant 0 : index
    %c11 = arith.constant 11 : index
    %c0_80 = arith.constant 0 : index
    %278 = vector.load %arg5[%c0_79, %c11, %c0_80] : memref<1x16x128xf32, #tpu.memory_space<vmem>>, vector<1x1x128xf32>
    %279 = vector.shape_cast %278 : vector<1x1x128xf32> to vector<1x128xf32>
    %280 = vector.shape_cast %277 : vector<1x128xf32> to vector<1x1x128xf32>
    tpu.vector_store %arg5[%c0_79, %c11, %c0_80], %280 {strides = array<i32>} : memref<1x16x128xf32, #tpu.memory_space<vmem>>, vector<1x1x128xf32>,
    %c0_81 = arith.constant 0 : index
    %c24 = arith.constant 24 : index
    %c0_82 = arith.constant 0 : index
    %281 = vector.load %arg2[%c0_81, %c24, %c0_82] : memref<1x32x128xf32, #tpu.memory_space<vmem>>, vector<1x4x128xf32>
    %282 = vector.shape_cast %281 : vector<1x4x128xf32> to vector<4x128xf32>
    %c0_83 = arith.constant 0 : index
    %c20_84 = arith.constant 20 : index
    %c0_85 = arith.constant 0 : index
    %283 = vector.load %arg2[%c0_83, %c20_84, %c0_85] : memref<1x32x128xf32, #tpu.memory_space<vmem>>, vector<1x4x128xf32>
    %284 = vector.shape_cast %283 : vector<1x4x128xf32> to vector<4x128xf32>
    %285 = arith.maximumf %282, %284 : vector<4x128xf32>
    %c0_86 = arith.constant 0 : index
    %c28 = arith.constant 28 : index
    %c0_87 = arith.constant 0 : index
    %286 = vector.load %arg2[%c0_86, %c28, %c0_87] : memref<1x32x128xf32, #tpu.memory_space<vmem>>, vector<1x4x128xf32>
    %287 = vector.shape_cast %286 : vector<1x4x128xf32> to vector<4x128xf32>
    %288 = arith.maximumf %285, %287 : vector<4x128xf32>
    %289 = vector.extract_strided_slice %288 {offsets = [0, 0], sizes = [1, 128], strides = [1, 1]} : vector<4x128xf32> to vector<1x128xf32>
    %290 = vector.broadcast %0 : f32 to vector<1x128xf32>
    %291 = arith.mulf %289, %290 : vector<1x128xf32>
    %292 = vector.extract_strided_slice %288 {offsets = [1, 0], sizes = [1, 128], strides = [1, 1]} : vector<4x128xf32> to vector<1x128xf32>
    %293 = vector.broadcast %1 : f32 to vector<1x128xf32>
    %294 = arith.mulf %292, %293 : vector<1x128xf32>
    %295 = arith.addf %291, %294 : vector<1x128xf32>
    %296 = vector.extract_strided_slice %288 {offsets = [2, 0], sizes = [1, 128], strides = [1, 1]} : vector<4x128xf32> to vector<1x128xf32>
    %297 = vector.broadcast %2 : f32 to vector<1x128xf32>
    %298 = arith.mulf %296, %297 : vector<1x128xf32>
    %299 = arith.addf %295, %298 : vector<1x128xf32>
    %300 = vector.extract_strided_slice %288 {offsets = [3, 0], sizes = [1, 128], strides = [1, 1]} : vector<4x128xf32> to vector<1x128xf32>
    %301 = vector.broadcast %3 : f32 to vector<1x128xf32>
    %302 = arith.mulf %300, %301 : vector<1x128xf32>
    %303 = arith.addf %299, %302 : vector<1x128xf32>
    %304 = vector.broadcast %16 : f32 to vector<1x128xf32>
    %305 = arith.addf %303, %304 : vector<1x128xf32>
    %c0_88 = arith.constant 0 : index
    %c12_89 = arith.constant 12 : index
    %c0_90 = arith.constant 0 : index
    %306 = vector.load %arg5[%c0_88, %c12_89, %c0_90] : memref<1x16x128xf32, #tpu.memory_space<vmem>>, vector<1x1x128xf32>
    %307 = vector.shape_cast %306 : vector<1x1x128xf32> to vector<1x128xf32>
    %308 = vector.shape_cast %305 : vector<1x128xf32> to vector<1x1x128xf32>
    tpu.vector_store %arg5[%c0_88, %c12_89, %c0_90], %308 {strides = array<i32>} : memref<1x16x128xf32, #tpu.memory_space<vmem>>, vector<1x1x128xf32>,
    %309 = vector.extract_strided_slice %288 {offsets = [0, 0], sizes = [1, 128], strides = [1, 1]} : vector<4x128xf32> to vector<1x128xf32>
    %310 = vector.broadcast %4 : f32 to vector<1x128xf32>
    %311 = arith.mulf %309, %310 : vector<1x128xf32>
    %312 = vector.extract_strided_slice %288 {offsets = [1, 0], sizes = [1, 128], strides = [1, 1]} : vector<4x128xf32> to vector<1x128xf32>
    %313 = vector.broadcast %5 : f32 to vector<1x128xf32>
    %314 = arith.mulf %312, %313 : vector<1x128xf32>
    %315 = arith.addf %311, %314 : vector<1x128xf32>
    %316 = vector.extract_strided_slice %288 {offsets = [2, 0], sizes = [1, 128], strides = [1, 1]} : vector<4x128xf32> to vector<1x128xf32>
    %317 = vector.broadcast %6 : f32 to vector<1x128xf32>
    %318 = arith.mulf %316, %317 : vector<1x128xf32>
    %319 = arith.addf %315, %318 : vector<1x128xf32>
    %320 = vector.extract_strided_slice %288 {offsets = [3, 0], sizes = [1, 128], strides = [1, 1]} : vector<4x128xf32> to vector<1x128xf32>
    %321 = vector.broadcast %7 : f32 to vector<1x128xf32>
    %322 = arith.mulf %320, %321 : vector<1x128xf32>
    %323 = arith.addf %319, %322 : vector<1x128xf32>
    %324 = vector.broadcast %17 : f32 to vector<1x128xf32>
    %325 = arith.addf %323, %324 : vector<1x128xf32>
    %c0_91 = arith.constant 0 : index
    %c13 = arith.constant 13 : index
    %c0_92 = arith.constant 0 : index
    %326 = vector.load %arg5[%c0_91, %c13, %c0_92] : memref<1x16x128xf32, #tpu.memory_space<vmem>>, vector<1x1x128xf32>
    %327 = vector.shape_cast %326 : vector<1x1x128xf32> to vector<1x128xf32>
    %328 = vector.shape_cast %325 : vector<1x128xf32> to vector<1x1x128xf32>
    tpu.vector_store %arg5[%c0_91, %c13, %c0_92], %328 {strides = array<i32>} : memref<1x16x128xf32, #tpu.memory_space<vmem>>, vector<1x1x128xf32>,
    %329 = vector.extract_strided_slice %288 {offsets = [0, 0], sizes = [1, 128], strides = [1, 1]} : vector<4x128xf32> to vector<1x128xf32>
    %330 = vector.broadcast %8 : f32 to vector<1x128xf32>
    %331 = arith.mulf %329, %330 : vector<1x128xf32>
    %332 = vector.extract_strided_slice %288 {offsets = [1, 0], sizes = [1, 128], strides = [1, 1]} : vector<4x128xf32> to vector<1x128xf32>
    %333 = vector.broadcast %9 : f32 to vector<1x128xf32>
    %334 = arith.mulf %332, %333 : vector<1x128xf32>
    %335 = arith.addf %331, %334 : vector<1x128xf32>
    %336 = vector.extract_strided_slice %288 {offsets = [2, 0], sizes = [1, 128], strides = [1, 1]} : vector<4x128xf32> to vector<1x128xf32>
    %337 = vector.broadcast %10 : f32 to vector<1x128xf32>
    %338 = arith.mulf %336, %337 : vector<1x128xf32>
    %339 = arith.addf %335, %338 : vector<1x128xf32>
    %340 = vector.extract_strided_slice %288 {offsets = [3, 0], sizes = [1, 128], strides = [1, 1]} : vector<4x128xf32> to vector<1x128xf32>
    %341 = vector.broadcast %11 : f32 to vector<1x128xf32>
    %342 = arith.mulf %340, %341 : vector<1x128xf32>
    %343 = arith.addf %339, %342 : vector<1x128xf32>
    %344 = vector.broadcast %18 : f32 to vector<1x128xf32>
    %345 = arith.addf %343, %344 : vector<1x128xf32>
    %c0_93 = arith.constant 0 : index
    %c14 = arith.constant 14 : index
    %c0_94 = arith.constant 0 : index
    %346 = vector.load %arg5[%c0_93, %c14, %c0_94] : memref<1x16x128xf32, #tpu.memory_space<vmem>>, vector<1x1x128xf32>
    %347 = vector.shape_cast %346 : vector<1x1x128xf32> to vector<1x128xf32>
    %348 = vector.shape_cast %345 : vector<1x128xf32> to vector<1x1x128xf32>
    tpu.vector_store %arg5[%c0_93, %c14, %c0_94], %348 {strides = array<i32>} : memref<1x16x128xf32, #tpu.memory_space<vmem>>, vector<1x1x128xf32>,
    %349 = vector.extract_strided_slice %288 {offsets = [0, 0], sizes = [1, 128], strides = [1, 1]} : vector<4x128xf32> to vector<1x128xf32>
    %350 = vector.broadcast %12 : f32 to vector<1x128xf32>
    %351 = arith.mulf %349, %350 : vector<1x128xf32>
    %352 = vector.extract_strided_slice %288 {offsets = [1, 0], sizes = [1, 128], strides = [1, 1]} : vector<4x128xf32> to vector<1x128xf32>
    %353 = vector.broadcast %13 : f32 to vector<1x128xf32>
    %354 = arith.mulf %352, %353 : vector<1x128xf32>
    %355 = arith.addf %351, %354 : vector<1x128xf32>
    %356 = vector.extract_strided_slice %288 {offsets = [2, 0], sizes = [1, 128], strides = [1, 1]} : vector<4x128xf32> to vector<1x128xf32>
    %357 = vector.broadcast %14 : f32 to vector<1x128xf32>
    %358 = arith.mulf %356, %357 : vector<1x128xf32>
    %359 = arith.addf %355, %358 : vector<1x128xf32>
    %360 = vector.extract_strided_slice %288 {offsets = [3, 0], sizes = [1, 128], strides = [1, 1]} : vector<4x128xf32> to vector<1x128xf32>
    %361 = vector.broadcast %15 : f32 to vector<1x128xf32>
    %362 = arith.mulf %360, %361 : vector<1x128xf32>
    %363 = arith.addf %359, %362 : vector<1x128xf32>
    %364 = vector.broadcast %19 : f32 to vector<1x128xf32>
    %365 = arith.addf %363, %364 : vector<1x128xf32>
    %c0_95 = arith.constant 0 : index
    %c15 = arith.constant 15 : index
    %c0_96 = arith.constant 0 : index
    %366 = vector.load %arg5[%c0_95, %c15, %c0_96] : memref<1x16x128xf32, #tpu.memory_space<vmem>>, vector<1x1x128xf32>
    %367 = vector.shape_cast %366 : vector<1x1x128xf32> to vector<1x128xf32>
    %368 = vector.shape_cast %365 : vector<1x128xf32> to vector<1x1x128xf32>
    tpu.vector_store %arg5[%c0_95, %c15, %c0_96], %368 {strides = array<i32>} : memref<1x16x128xf32, #tpu.memory_space<vmem>>, vector<1x1x128xf32>,
    return
  }
  func.func @transform_0(%arg0: i32, %arg1: i32) -> (i32, i32, i32) {
    %c0_i32 = arith.constant 0 : i32
    %c0_i32_0 = arith.constant 0 : i32
    return %arg0, %c0_i32, %arg1 : i32, i32, i32
  }
  func.func @transform_1(%arg0: i32, %arg1: i32) -> (i32, i32) {
    %c0_i32 = arith.constant 0 : i32
    %c0_i32_0 = arith.constant 0 : i32
    %c0_i32_1 = arith.constant 0 : i32
    return %c0_i32, %c0_i32_0 : i32, i32
  }
  func.func @transform_2(%arg0: i32, %arg1: i32) -> i32 {
    %c0_i32 = arith.constant 0 : i32
    %c0_i32_0 = arith.constant 0 : i32
    return %c0_i32 : i32
  }
  func.func @transform_3(%arg0: i32, %arg1: i32) -> (i32, i32, i32) {
    %c0_i32 = arith.constant 0 : i32
    %c0_i32_0 = arith.constant 0 : i32
    return %arg0, %c0_i32, %arg1 : i32, i32, i32
  }
}

</mosaic_0001>

<bundles_post_ra>
// kernel: tpu_custom_call.1
= control target key start
LH: loop header
LB: loop body
LE: loop exit
PB: predicated region body
PF: predicated region fallthrough
CT: control target
= control target key end

     0   :  { %s1476_s0 = inlined_call_operand.hbm [shape: f32[2,32,256], index: 0, kind: input, shape index: {}]   ;;  %s1477_s1 = inlined_call_operand.hbm [shape: f32[4,4], index: 1, kind: input, shape index: {}]   ;;  %s1478_s2 = inlined_call_operand.vmem [shape: f32[4], index: 2, kind: input, shape index: {}]   ;;  %s1479_s3 = inlined_call_operand.hbm [shape: f32[2,16,256], index: 3, kind: output, shape index: {}]  }
   0x1   :  { %1484 = sst [smem:[#allocation18_spill]] %s1477_s1 }
   0x2   :  { %1485 = sst [smem:[#allocation19_spill]] %s1478_s2 }
   0x3   :  { %8 = vsyncpa [#allocation3], 0 }
   0x4   :  { %10 = vsyncpa [#allocation3 + $0x1], 0 }
   0x5   :  { %11 = vsyncpa [#allocation5], 0 }
   0x6   :  { %12 = vsyncpa [#allocation6], 0 }
   0x7   :  { %13 = vsyncpa [#allocation4], 0 }
   0x8   :  { %15 = vsyncpa [#allocation4 + $0x1], 0  ;;  %s1048_s12 = smov 0   ;;  %s1050_s13 = smov 0  }
   0x9   :  { %s1052_s14 = smov 0   ;;  %s1054_s15 = smov 0  }
   0xa   :  { %s1056_s16 = smov 0   ;;  %s1058_s17 = smov 0  }
   0xb   :  { %s1060_s18 = smov 0   ;;  %s1062_s19 = smov 0  }
   0xc LB: > { %1486 = sst [smem:[#allocation14_spill]] %s990_s12  ;;  %s710_s20 = sadd.s32 4294967295, %s1018_s19   ;;  %s1018_s19 = sphi %s1062_s19, %s21_s19   ;;  %s1014_s18 = sphi %s1060_s18, %s1509_s18   ;;  %s1010_s17 = sphi %s1058_s17, %s1504_s17   ;;  %s1006_s16 = sphi %s1056_s16, %s1508_s16   ;;  %s1002_s15 = sphi %s1054_s15, %s1503_s15   ;;  %s998_s14 = sphi %s1052_s14, %s1507_s14   ;;  %s994_s13 = sphi %s1050_s13, %s1506_s13   ;;  %s990_s12 = sphi %s1048_s12, %s1505_s12  }
   0xd   : > { %1487 = sst [smem:[#allocation15_spill]] %s1010_s17  ;;  %s711_s21 = sadd.s32 4294967294, %s1018_s19  }
   0xe   : > { %p49_p0 = scmp.ne.s32.totalorder %s998_s14, %s994_s13  ;;  %p50_p1 = scmp.eq.s32.totalorder %s1018_s19, 0 }
   0xf   : > { %p55_p2 = scmp.ne.s32.totalorder %s994_s13, %s990_s12  ;;  %p1096_p3 = scmp.eq.s32.totalorder %s710_s20, 0 }
  0x10   : > { %p123_p4 = scmp.eq.s32.totalorder %s710_s20, 3  ;;  %p1100_p5 = por %p50_p1, %p49_p0 }
  0x11   : > { %p129_p6 = scmp.eq.s32.totalorder %s711_s21, 3  ;;  %p1106_p7 = por %p1096_p3, %p55_p2 }
  0x12   : > { %p1110_p8 = por %p123_p4, %p49_p0  ;;  %p712_p10 = scmp.ge.s32.totalorder %s1018_s19, 1 }
  0x13   : > { %p1114_p9 = por %p129_p6, %p55_p2  ;;  %p136_p11 = scmp.lt.s32.totalorder %s1018_s19, 5 }
  0x14   : > { %s1494_s1 = sld [smem:[#allocation18_spill]]  ;;  %p776_p13 = scmp.lt.s32.totalorder %s1018_s19, 4 }
  0x15   : > { %s1492_s27 = scalar_select %p1114_p9, 1, 0 }
  0x16   : > { %p1123_p12 = pnand %p712_p10, %p136_p11  ;;  %s1496_s2 = sld [smem:[#allocation19_spill]] }
  0x17   : > { %1493 = sst [smem:[#allocation16_spill]] %s1492_s27  ;;  %p1135_p1 = pnand %p776_p13, %p1100_p5 }
  0x18   : > { %p759_p0 = pneg %p1123_p12  ;;  %s1020_s9 = smov [#allocation7]  }
  0x19   : > { %s1021_s10 = smov [#allocation8]   ;;  %s30_s11 = sadd.s32 1, %s1010_s17 }
  0x1a   : > { %s148_s30 = sshll.u32 %s1494_s1, 4  ;;  %p760_p2 = pnand %p759_p0, %p1096_p3  ;;  %s149_s30 = int_to_ptr.hbm [resolvable:$true] %s148_s30 }
  0x1b   : > { %s33_s20 = sadd.s32 1, %s1014_s18  ;;  %p31_p4 = scmp.ge.s32.totalorder %s30_s11, 2 }
  0x1c   : > { %s158_s7 = sshll.u32 %s1496_s2, 4  ;;  %s169_s21 = sand.u32 1, %s998_s14   ;;  %s159_s7 = int_to_ptr.vmem [resolvable:$true] %s158_s7 }
  0x1d   : > { %762 = dma.hbm_to_smem (!%p760_p2), %s149_s30, 64, %s1020_s9, [#allocation5]  }
  0x1e   : > { %765 = dma.vmem_to_smem (!%p760_p2), %s159_s7, 16, %s1021_s10, [#allocation6]  }
  0x1f   : > { %s716_s28 = sshll.u32 %s169_s21, 5  ;;  %s1511_s11 = smov (%p31_p4, %s30_s11), 0 }
  0x20   : > { %1498 = sst [smem:[#allocation17_spill]] %s1511_s11  ;;  %s1513_s20 = smov (!%p31_p4, %s33_s20), %s1014_s18 }
  0x21   : > { %s38_s24 = ssub.s32 %s1010_s17, %s1511_s11  ;;  %p35_p5 = scmp.ge.s32.totalorder %s1513_s20, 2 }
  0x22   : > { %s717_s29 = sshll.u32 %s1014_s18, 3  ;;  %s173_s6 = scalar_lea.vmem [#allocation2], %s716_s28 }
  0x23   : > { %s177_s5 = sadd.s32 %s1010_s17, %s717_s29  ;;  %s182_s30 = sshll.u32 %s173_s6, 4  ;;  %s183_s30 = int_to_ptr.vmem [resolvable:$true] %s182_s30 }
  0x24   : > { %s1515_s20 = smov (%p35_p5, %s1513_s20), 0  ;;  %s718_s7 = sshll.u32 %s177_s5, 3 }
  0x25   : > { %s37_s9 = ssub.s32 %s1014_s18, %s1515_s20  ;;  %s179_s1 = scalar_lea.hbm %s1476_s0, %s718_s7 }
  0x26   : > { %s39_s2 = sor.u32 %s38_s24, %s37_s9  ;;  %s180_s27 = sshll.u32 %s179_s1, 4  ;;  %s181_s27 = int_to_ptr.hbm [resolvable:$true] %s180_s27 }
  0x27   : > { %p40_p6 = scmp.eq.s32.totalorder %s39_s2, 0  ;;  %s1499_s11 = sadd.s32 1, %s998_s14 }
  0x28   : > { %s170_s28 = scalar_lea.sflag [#allocation3], %s169_s21  ;;  %s1022_s29 = smov 256  }
  0x29   : > { %s1161_s12 = scalar_select %p40_p6, %s998_s14, %s1499_s11  }
  0x2a   : > { %s1023_s6 = smov 128   ;;  %s1024_s17 = smov 8  }
  0x2b   : > { %769 = dma.hbm_to_vmem [thread:$0]  (!%p1135_p1), %s181_s27, 512, %s183_s30, %s170_s28, %s1022_s29, %s1023_s6, %s1024_s17  }
  0x2c   : > { %194 = sbr.rel (%p1123_p12) target bundleno = 124 (0x7c), region = 32  ;;  %s1168_s22 = sand.u32 (!%p1123_p12), 1, %s994_s13  }
  0x2d   : > { %s720_s1 = sshll.u32 (!%p1123_p12), %s1168_s22, 5  ;;  %s197_s2 = scalar_lea.sflag (!%p1123_p12), [#allocation3], %s1168_s22 }
  0x2e   : > { %s1172_s24 = scalar_lea.vmem (!%p1123_p12), [#allocation2], %s720_s1 }
  0x31   : > { %973 = dma.done.wait (%p1106_p7), %s197_s2, 512  }
  0x32   : > { %975 = vsyncadd (%p1106_p7), %s197_s2, 4294966784 }
  0x33   : > { %977 = dma.done.wait (%p1096_p3), [#allocation5], 64  }
  0x34   : > { %979 = vsyncadd (%p1096_p3), [#allocation5], 4294967232 }
  0x35   : > { %981 = dma.done.wait (%p1096_p3), [#allocation6], 16  }
  0x36   : > { %983 = vsyncadd (%p1096_p3), [#allocation6], 4294967280 }
  0x37   : > { %216 = sfence }
  0x38   : > { %s235_s17 = sld [smem:[#allocation7]]  ;;  %v255_v0 = vld [vmem:[%s1172_s24] sm:$0xf]  ;;  %v256_v1 = vld [vmem:[%s1172_s24 + $0x4] sm:$0xf]  ;;  %s723_s29 = sshll.u32 %s1168_s22, 4 }
  0x39   : > { %s724_s25 = sld [smem:[#allocation7 + $0x1]]  ;;  %v350_v2 = vld [vmem:[%s1172_s24 + $0x8] sm:$0xf]  ;;  %v351_v3 = vld [vmem:[%s1172_s24 + $0x4] sm:$0xf]  ;;  %v1192_v7 = vmax.f32 %v255_v0, %v256_v1 }
  0x3a   : > { %s725_s27 = sld [smem:[#allocation7 + $0x2]]  ;;  %v352_v4 = vmax.f32 %v350_v2, %v351_v3  ;;  %v353_v5 = vld [vmem:[%s1172_s24 + $0xc] sm:$0xf]  ;;  %v427_v6 = vld [vmem:[%s1172_s24 + $0x10] sm:$0xf] }
  0x3b   : > { %s726_s23 = sld [smem:[#allocation7 + $0x3]]  ;;  %v428_v8 = vld [vmem:[%s1172_s24 + $0xc] sm:$0xf]  ;;  %v430_v9 = vld [vmem:[%s1172_s24 + $0x14] sm:$0xf] }
  0x3c   : > { %s251_s4 = sld [smem:[#allocation8]]  ;;  %v1196_v10 = vmax.f32 %v352_v4, %v353_v5  ;;  %v429_v11 = vmax.f32 %v427_v6, %v428_v8  ;;  %v504_v12 = vld [vmem:[%s1172_s24 + $0x18] sm:$0xf]  ;;  %v505_v13 = vld [vmem:[%s1172_s24 + $0x14] sm:$0xf] }
  0x3d   : > { %s727_s8 = sld [smem:[#allocation7 + $0x80]]  ;;  %v506_v15 = vmax.f32 %v504_v12, %v505_v13  ;;  %v507_v16 = vld [vmem:[%s1172_s24 + $0x1c] sm:$0xf] }
  0x3e   : > { %v1200_v14 = vstv %s235_s17  ;;  %s1202_s11 = sld [smem:[#allocation7 + $0x81]]  ;;  %v1211_v20 = vmax.f32 %v429_v11, %v430_v9 }
  0x3f   : > { %v259_v17 = vmul.f32 %v1200_v14, %v1192_v7  ;;  %v1207_v18 = vstv %s724_s25  ;;  %s729_s21 = sld [smem:[#allocation7 + $0x82]]  ;;  %v355_v19 = vmul.f32 %v1196_v10, %v1200_v14  ;;  %v1221_v24 = vmax.f32 %v506_v15, %v507_v16 }
  0x40   : > { %v261_v21 = vmul.f32 %v1207_v18, %v1192_v7  ;;  %v1215_v22 = vstv %s725_s27  ;;  %s1217_s5 = sld [smem:[#allocation7 + $0x83]]  ;;  %v356_v23 = vmul.f32 %v1196_v10, %v1207_v18  ;;  %v1233_v28 = vmul.f32 %v1211_v20, %v1200_v14  ;;  %s1292_s27 = scalar_lea.vmem [#allocation9], %s723_s29 }
  0x41   : > { %v267_v25 = vmul.f32 %v1215_v22, %v1192_v7  ;;  %v1225_v26 = vstv %s726_s23  ;;  %s1227_s30 = sld [smem:[#allocation8 + $0x1]]  ;;  %v361_v27 = vmul.f32 %v1196_v10, %v1215_v22  ;;  %s743_s23 = sshll.u32 %s1006_s16, 2 }
  0x42   : > { %v263_v29 = vrot.slane %v261_v21, 1  ;;  %v273_v30 = vmul.f32 %v1225_v26, %v1192_v7  ;;  %v1237_v31 = vstv %s251_s4  ;;  %s731_s7 = sld [smem:[#allocation7 + $0x100]]  ;;  %v358_v32 = vrot.slane %v356_v23, 1  ;;  %s592_s16 = sadd.s32 %s1002_s15, %s743_s23 }
  0x43   : > { %v269_v33 = vrot.slane %v267_v25, 2  ;;  %v1239_v34 = vstv %s727_s8  ;;  %s1241_s9 = sld [smem:[#allocation7 + $0x101]]  ;;  %v363_v35 = vrot.slane %v361_v27, 2  ;;  %v366_v36 = vmul.f32 %v1196_v10, %v1225_v26  ;;  %s744_s15 = sshll.u32 %s592_s16, 3 }
  0x44   : > { %v265_v37 = vadd.f32 %v263_v29, %v259_v17  ;;  %v275_v38 = vrot.slane %v273_v30, 3  ;;  %v282_v39 = vmul.f32 %v1239_v34, %v1192_v7  ;;  %v1248_v40 = vstv %s1202_s11  ;;  %s733_s10 = sld [smem:[#allocation7 + $0x102]]  ;;  %s594_s11 = scalar_lea.hbm %s1479_s3, %s744_s15 }
  0x45   : > { %v284_v41 = vmul.f32 %v1248_v40, %v1192_v7  ;;  %v1252_v42 = vstv %s729_s21  ;;  %s1254_s28 = sld [smem:[#allocation7 + $0x103]]  ;;  %v360_v43 = vadd.f32 %v358_v32, %v355_v19  ;;  %v368_v44 = vrot.slane %v366_v36, 3  ;;  %s595_s21 = sshll.u32 %s1292_s27, 4  ;;  %s596_s21 = int_to_ptr.vmem [resolvable:$true] %s595_s21 }
  0x46   : > { %v271_v45 = vadd.f32 %v269_v33, %v265_v37  ;;  %v290_v46 = vmul.f32 %v1252_v42, %v1192_v7  ;;  %v1260_v47 = vstv %s1217_s5  ;;  %s1262_s6 = sld [smem:[#allocation8 + $0x2]]  ;;  %v373_v48 = vmul.f32 %v1196_v10, %v1239_v34  ;;  %s597_s5 = sshll.u32 %s594_s11, 4  ;;  %s598_s5 = int_to_ptr.hbm [resolvable:$true] %s597_s5 }
  0x47   : > { %v286_v49 = vrot.slane %v284_v41, 1  ;;  %v296_v50 = vmul.f32 %v1260_v47, %v1192_v7  ;;  %v1269_v51 = vstv %s1227_s30  ;;  %s735_s1 = sld [smem:[#allocation7 + $0x180]]  ;;  %v365_v52 = vadd.f32 %v363_v35, %v360_v43  ;;  %s582_s30 = scalar_lea.sflag [#allocation4], %s1168_s22 }
  0x48   : > { %v277_v53 = vadd.f32 %v275_v38, %v271_v45  ;;  %v292_v54 = vrot.slane %v290_v46, 2  ;;  %v1271_v55 = vstv %s731_s7  ;;  %s736_s2 = sld [smem:[#allocation7 + $0x181]]  ;;  %v374_v56 = vmul.f32 %v1196_v10, %v1248_v40  ;;  %s926_s7 = sshra.s32 %s598_s5, 4  ;;  %s927_s7 = int_to_ptr.hbm [resolvable:$true] %s926_s7 }
  0x49   : > { %v288_v57 = vadd.f32 %v286_v49, %v282_v39  ;;  %v298_v58 = vrot.slane %v296_v50, 3  ;;  %v305_v59 = vmul.f32 %v1271_v55, %v1192_v7  ;;  %v1278_v60 = vstv %s1241_s9  ;;  %s737_s24 = sld [smem:[#allocation7 + $0x182]]  ;;  %s928_s9 = scalar_lea.hbm %s927_s7, 16 }
  0x4a   : > { %v279_v61 = vadd.f32 %v1237_v31, %v277_v53  ;;  %v307_v62 = vmul.f32 %v1278_v60, %v1192_v7  ;;  %v1283_v63 = vstv %s733_s10  ;;  %s738_s17 = sld [smem:[#allocation7 + $0x183]]  ;;  %v370_v0 = vadd.f32 %v368_v44, %v365_v52  ;;  %p929_p3 = scmp.ne.s32.totalorder %s927_s7, %s928_s9 }
  0x4b   : > { %v294_v1 = vadd.f32 %v292_v54, %v288_v57  ;;  %v313_v2 = vmul.f32 %v1283_v63, %v1192_v7  ;;  %v1288_v3 = vstv %s1254_s28  ;;  %s741_s25 = sld [smem:[#allocation8 + $0x3]]  ;;  %v376_v4 = vrot.slane %v374_v56, 1  ;;  %s932_s29 = scalar_lea.hbm %s1479_s3, 64 }
  0x4c   : > { %280 = vst [vmem:[%s1292_s27] sm:$0x1] %v279_v61  ;;  %v309_v5 = vrot.slane %v307_v62, 1  ;;  %v319_v6 = vmul.f32 %v1288_v3, %v1192_v7  ;;  %v1298_v8 = vstv %s1262_s6  ;;  %v371_v9 = vadd.f32 %v370_v0, %v1237_v31  ;;  %p930_p7 = pnand %p929_p3, %p1110_p8  ;;  %p933_p11 = scmp.lt.s32.totalorder %s927_s7, %s1479_s3 }
  0x4d   : > { %v300_v11 = vadd.f32 %v298_v58, %v294_v1  ;;  %v315_v12 = vrot.slane %v313_v2, 2  ;;  %v1301_v13 = vstv %s735_s1  ;;  %v378_v15 = vadd.f32 %v376_v4, %v373_v48  ;;  %p934_p12 = scmp.lt.s32.totalorder %s932_s29, %s928_s9 }
  0x4e   : > { %v311_v16 = vadd.f32 %v309_v5, %v305_v59  ;;  %v321_v17 = vrot.slane %v319_v6, 3  ;;  %v328_v19 = vmul.f32 %v1301_v13, %v1192_v7  ;;  %v1305_v21 = vstv %s736_s2  ;;  %372 = vst [vmem:[%s1292_s27 + $0x4] sm:$0x1] %v371_v9  ;;  %p931_p10 = pneg %p930_p7 }
  0x4f   : > { %v302_v23 = vadd.f32 %v1269_v51, %v300_v11  ;;  %v330_v25 = vmul.f32 %v1305_v21, %v1192_v7  ;;  %v1311_v27 = vstv %s737_s24  ;;  %v379_v29 = vmul.f32 %v1196_v10, %v1252_v42  ;;  %p935_p13 = por %p934_p12, %p933_p11 }
  0x50   : > { %v317_v30 = vadd.f32 %v315_v12, %v311_v16  ;;  %v336_v32 = vmul.f32 %v1311_v27, %v1192_v7  ;;  %v1317_v33 = vstv %s738_s17  ;;  %v384_v35 = vmul.f32 %v1196_v10, %v1260_v47 }
  0x51   : > { %303 = vst [vmem:[%s1292_s27 + $0x1] sm:$0x1] %v302_v23  ;;  %v332_v36 = vrot.slane %v330_v25, 1  ;;  %v342_v37 = vmul.f32 %v1317_v33, %v1192_v7  ;;  %v1324_v38 = vstv %s741_s25  ;;  %v381_v39 = vrot.slane %v379_v29, 2  ;;  %p936_p0 = pnand %p935_p13, %p931_p10 }
  0x52   : > { %v323_v41 = vadd.f32 %v321_v17, %v317_v30  ;;  %v338_v43 = vrot.slane %v336_v32, 2  ;;  %v386_v44 = vrot.slane %v384_v35, 3  ;;  %v391_v45 = vmul.f32 %v1196_v10, %v1271_v55 }
  0x53   : > { %v334_v46 = vadd.f32 %v332_v36, %v328_v19  ;;  %v344_v48 = vrot.slane %v342_v37, 3  ;;  %v383_v49 = vadd.f32 %v381_v39, %v378_v15  ;;  %v392_v50 = vmul.f32 %v1196_v10, %v1278_v60 }
  0x54   : > { %v325_v52 = vadd.f32 %v1298_v8, %v323_v41  ;;  %v397_v7 = vmul.f32 %v1196_v10, %v1283_v63  ;;  %v402_v53 = vmul.f32 %v1196_v10, %v1288_v3  ;;  %v409_v54 = vmul.f32 %v1196_v10, %v1301_v13 }
  0x55   : > { %v340_v56 = vadd.f32 %v338_v43, %v334_v46  ;;  %v388_v57 = vadd.f32 %v386_v44, %v383_v49  ;;  %v394_v58 = vrot.slane %v392_v50, 1  ;;  %v410_v59 = vmul.f32 %v1196_v10, %v1305_v21 }
  0x56   : > { %326 = vst [vmem:[%s1292_s27 + $0x2] sm:$0x1] %v325_v52  ;;  %v399_v61 = vrot.slane %v397_v7, 2  ;;  %v404_v62 = vrot.slane %v402_v53, 3  ;;  %v415_v0 = vmul.f32 %v1196_v10, %v1311_v27  ;;  %v420_v1 = vmul.f32 %v1196_v10, %v1317_v33 }
  0x57   : > { %v346_v2 = vadd.f32 %v344_v48, %v340_v56  ;;  %v389_v4 = vadd.f32 %v388_v57, %v1269_v51  ;;  %v396_v5 = vadd.f32 %v394_v58, %v391_v45  ;;  %v412_v6 = vrot.slane %v410_v59, 1 }
  0x58   : > { %v417_v9 = vrot.slane %v415_v0, 2  ;;  %v422_v11 = vrot.slane %v420_v1, 3  ;;  %v433_v12 = vmul.f32 %v1211_v20, %v1207_v18  ;;  %v438_v15 = vmul.f32 %v1211_v20, %v1215_v22 }
  0x59   : > { %v348_v16 = vadd.f32 %v1324_v38, %v346_v2  ;;  %390 = vst [vmem:[%s1292_s27 + $0x5] sm:$0x1] %v389_v4  ;;  %v401_v17 = vadd.f32 %v399_v61, %v396_v5  ;;  %v414_v19 = vadd.f32 %v412_v6, %v409_v54  ;;  %v443_v10 = vmul.f32 %v1211_v20, %v1225_v26 }
  0x5a   : > { %v435_v23 = vrot.slane %v433_v12, 1  ;;  %v440_v25 = vrot.slane %v438_v15, 2  ;;  %v450_v29 = vmul.f32 %v1211_v20, %v1239_v34  ;;  %v451_v30 = vmul.f32 %v1211_v20, %v1248_v40 }
  0x5b   : > { %349 = vst [vmem:[%s1292_s27 + $0x3] sm:$0x1] %v348_v16  ;;  %v406_v32 = vadd.f32 %v404_v62, %v401_v17  ;;  %v419_v35 = vadd.f32 %v417_v9, %v414_v19  ;;  %v445_v36 = vrot.slane %v443_v10, 3  ;;  %v456_v37 = vmul.f32 %v1211_v20, %v1252_v42 }
  0x5c   : > { %v437_v39 = vadd.f32 %v435_v23, %v1233_v28  ;;  %v453_v41 = vrot.slane %v451_v30, 1  ;;  %v461_v43 = vmul.f32 %v1211_v20, %v1260_v47  ;;  %v468_v44 = vmul.f32 %v1211_v20, %v1271_v55 }
  0x5d   : > { %v407_v45 = vadd.f32 %v406_v32, %v1298_v8  ;;  %v424_v46 = vadd.f32 %v422_v11, %v419_v35  ;;  %v458_v48 = vrot.slane %v456_v37, 2  ;;  %v469_v49 = vmul.f32 %v1211_v20, %v1278_v60 }
  0x5e   : > { %v442_v50 = vadd.f32 %v440_v25, %v437_v39  ;;  %v455_v52 = vadd.f32 %v453_v41, %v450_v29  ;;  %v463_v7 = vrot.slane %v461_v43, 3  ;;  %v474_v28 = vmul.f32 %v1211_v20, %v1283_v63 }
  0x5f   : > { %408 = vst [vmem:[%s1292_s27 + $0x6] sm:$0x1] %v407_v45  ;;  %v425_v53 = vadd.f32 %v424_v46, %v1324_v38  ;;  %v471_v54 = vrot.slane %v469_v49, 1  ;;  %v479_v56 = vmul.f32 %v1211_v20, %v1288_v3  ;;  %v486_v57 = vmul.f32 %v1211_v20, %v1301_v13 }
  0x60   : > { %v447_v58 = vadd.f32 %v445_v36, %v442_v50  ;;  %v460_v59 = vadd.f32 %v458_v48, %v455_v52  ;;  %v476_v61 = vrot.slane %v474_v28, 2  ;;  %v487_v62 = vmul.f32 %v1211_v20, %v1305_v21 }
  0x61   : > { %426 = vst [vmem:[%s1292_s27 + $0x7] sm:$0x1] %v425_v53  ;;  %v473_v0 = vadd.f32 %v471_v54, %v468_v44  ;;  %v481_v1 = vrot.slane %v479_v56, 3  ;;  %v492_v2 = vmul.f32 %v1211_v20, %v1311_v27  ;;  %v497_v4 = vmul.f32 %v1211_v20, %v1317_v33 }
  0x62   : > { %v448_v5 = vadd.f32 %v447_v58, %v1237_v31  ;;  %v465_v6 = vadd.f32 %v463_v7, %v460_v59  ;;  %v489_v9 = vrot.slane %v487_v62, 1  ;;  %v509_v11 = vmul.f32 %v1221_v24, %v1200_v14 }
  0x63   : > { %v478_v12 = vadd.f32 %v476_v61, %v473_v0  ;;  %v494_v15 = vrot.slane %v492_v2, 2  ;;  %v499_v16 = vrot.slane %v497_v4, 3  ;;  %v510_v17 = vmul.f32 %v1221_v24, %v1207_v18 }
  0x64   : > { %449 = vst [vmem:[%s1292_s27 + $0x8] sm:$0x1] %v448_v5  ;;  %v466_v19 = vadd.f32 %v465_v6, %v1269_v51  ;;  %v491_v10 = vadd.f32 %v489_v9, %v486_v57  ;;  %v515_v20 = vmul.f32 %v1221_v24, %v1215_v22  ;;  %v520_v23 = vmul.f32 %v1221_v24, %v1225_v26 }
  0x65   : > { %v483_v25 = vadd.f32 %v481_v1, %v478_v12  ;;  %v512_v29 = vrot.slane %v510_v17, 1  ;;  %v527_v14 = vmul.f32 %v1221_v24, %v1239_v34  ;;  %v528_v30 = vmul.f32 %v1221_v24, %v1248_v40 }
  0x66   : > { %467 = vst [vmem:[%s1292_s27 + $0x9] sm:$0x1] %v466_v19  ;;  %v496_v18 = vadd.f32 %v494_v15, %v491_v10  ;;  %v517_v32 = vrot.slane %v515_v20, 2  ;;  %v522_v35 = vrot.slane %v520_v23, 3  ;;  %v533_v22 = vmul.f32 %v1221_v24, %v1252_v42 }
  0x67   : > { %v484_v26 = vadd.f32 %v483_v25, %v1298_v8  ;;  %v514_v36 = vadd.f32 %v512_v29, %v509_v11  ;;  %v530_v37 = vrot.slane %v528_v30, 1  ;;  %v538_v34 = vmul.f32 %v1221_v24, %v1260_v47 }
  0x68   : > { %v501_v39 = vadd.f32 %v499_v16, %v496_v18  ;;  %v535_v41 = vrot.slane %v533_v22, 2  ;;  %v545_v40 = vmul.f32 %v1221_v24, %v1271_v55  ;;  %v546_v43 = vmul.f32 %v1221_v24, %v1278_v60 }
  0x69   : > { %485 = vst [vmem:[%s1292_s27 + $0xa] sm:$0x1] %v484_v26  ;;  %v519_v44 = vadd.f32 %v517_v32, %v514_v36  ;;  %v532_v42 = vadd.f32 %v530_v37, %v527_v14  ;;  %v540_v45 = vrot.slane %v538_v34, 3  ;;  %v551_v46 = vmul.f32 %v1221_v24, %v1283_v63 }
  0x6a   : > { %v502_v48 = vadd.f32 %v501_v39, %v1324_v38  ;;  %v548_v47 = vrot.slane %v546_v43, 1  ;;  %v556_v49 = vmul.f32 %v1221_v24, %v1288_v3  ;;  %v563_v55 = vmul.f32 %v1221_v24, %v1301_v13 }
  0x6b   : > { %v524_v50 = vadd.f32 %v522_v35, %v519_v44  ;;  %v537_v60 = vadd.f32 %v535_v41, %v532_v42  ;;  %v553_v52 = vrot.slane %v551_v46, 2  ;;  %v564_v7 = vmul.f32 %v1221_v24, %v1305_v21 }
  0x6c   : > { %503 = vst [vmem:[%s1292_s27 + $0xb] sm:$0x1] %v502_v48  ;;  %v550_v63 = vadd.f32 %v548_v47, %v545_v40  ;;  %v558_v28 = vrot.slane %v556_v49, 3  ;;  %v569_v53 = vmul.f32 %v1221_v24, %v1311_v27  ;;  %v574_v3 = vmul.f32 %v1221_v24, %v1317_v33 }
  0x6d   : > { %v525_v13 = vadd.f32 %v524_v50, %v1237_v31  ;;  %v542_v54 = vadd.f32 %v540_v45, %v537_v60  ;;  %v566_v56 = vrot.slane %v564_v7, 1 }
  0x6e   : > { %v555_v57 = vadd.f32 %v553_v52, %v550_v63  ;;  %v571_v58 = vrot.slane %v569_v53, 2  ;;  %v576_v59 = vrot.slane %v574_v3, 3 }
  0x6f   : > { %526 = vst [vmem:[%s1292_s27 + $0xc] sm:$0x1] %v525_v13  ;;  %v543_v21 = vadd.f32 %v542_v54, %v1269_v51  ;;  %v568_v27 = vadd.f32 %v566_v56, %v563_v55 }
  0x70   : > { %v560_v61 = vadd.f32 %v558_v28, %v555_v57 }
  0x71   : > { %544 = vst [vmem:[%s1292_s27 + $0xd] sm:$0x1] %v543_v21  ;;  %v573_v24 = vadd.f32 %v571_v58, %v568_v27 }
  0x72   : > { %v561_v31 = vadd.f32 %v560_v61, %v1298_v8 }
  0x73   : > { %v578_v33 = vadd.f32 %v576_v59, %v573_v24 }
  0x74   : > { %562 = vst [vmem:[%s1292_s27 + $0xe] sm:$0x1] %v561_v31 }
  0x75   : > { %v579_v62 = vadd.f32 %v578_v33, %v1324_v38 }
  0x77   : > { %580 = vst [vmem:[%s1292_s27 + $0xf] sm:$0x1] %v579_v62 }
  0x78   : > { %939 = shalt.err (!%p936_p0)
}
  0x79   : > { %s1025_s22 = smov 128   ;;  %s1026_s2 = smov 256  }
  0x7a   : > { %s1027_s24 = smov 8  }
  0x7b   : > { %757 = dma.vmem_to_hbm [thread:$0]  (%p1110_p8), %s596_s21, 256, %s598_s5, %s582_s30, %s1025_s22, %s1026_s2, %s1027_s24  }
  0x7c PF: > { %s1500_s17 = sld [smem:[#allocation14_spill]]  ;;  %p779_p1 = scmp.ge.s32.totalorder %s1018_s19, 2 }
  0x7e   : > { %p771_p2 = pnand %p779_p1, %p1114_p9 }
  0x80   : > { %p772_p4 = pneg %p771_p2 }
  0x82   : > { %s612_s27 = sand.u32 1, %s1500_s17  }
  0x83   : > { %s613_s23 = scalar_lea.sflag [#allocation4], %s612_s27 }
  0x84   : > { %985 = dma.done.wait (%p772_p4), %s613_s23, 256  }
  0x85   : > { %987 = vsyncadd (%p772_p4), %s613_s23, 4294967040  ;;  %s21_s19 = sadd.s32 1, %s1018_s19   ;;  %s1502_s16 = smov %s1161_s12 }
  0x86   : > { %p18_p5 = scmp.ge.s32.totalorder %s21_s19, 6   ;;  %s1503_s15 = sld [smem:[#allocation15_spill]] }
  0x87   : > { %s1504_s17 = sld [smem:[#allocation17_spill]]  ;;  %s1505_s12 = smov %s994_s13 }
  0x88   : > { %s1506_s13 = smov %s998_s14  ;;  %s1507_s14 = smov %s1502_s16 }
  0x89   : > { %s1508_s16 = smov %s1014_s18  ;;  %s1509_s18 = smov %s1515_s20 }
  0x8a   :  { %20 = sbr.rel (!%p18_p5) target bundleno = 12 (0xc), region = 87 }
  0x8f   :  { %619 = vsyncpa [#allocation3], 1 }
  0x90   :  { %621 = vsyncpa [#allocation3 + $0x1], 1 }
  0x91   :  { %622 = vsyncpa [#allocation4], 1 }
  0x92   :  { %624 = vsyncpa [#allocation4 + $0x1], 1 }
  0x93   :  { %625 = vsyncpa [#allocation5], 1 }
  0x94   :  { %627 = vsyncpa [#allocation5 + $0x1], 1 }
  0x95   :  { %628 = vsyncpa [#allocation6], 1 }
  0x96   :  { %630 = vsyncpa [#allocation6 + $0x1], 1 }

</bundles_post_ra>
